<compile_context>
chip_gen: v7x
topology: tpu7x:2x2x1
jax: 0.10.0
libtpu: 0.0.40
codegen_flags: <defaults>
</compile_context>

<pallas_src>
import functools
import math

import jax
import jax.numpy as jnp
from jax.experimental import pallas as pl
from jax.experimental.pallas import tpu as pltpu

_NEG_INF = -1e30
_LANE = 128


def _round_up(x, m):
    return (x + m - 1) // m * m


def _neg_leaky_relu(x, alpha):
    # -LeakyReLU(x) with negative slope alpha.  For alpha <= 1 the max form
    # saves one compare+select per element on the hot tile.
    if alpha <= 1.0:
        return -jnp.maximum(x, alpha * x)
    return -jnp.where(x > 0, x, alpha * x)


# ---------------------------------------------------------------------------
# Kernel 1: row-tiled pre-pass (h in bf16, e1, e2 in f32).
# ---------------------------------------------------------------------------
def _prepass_kernel(x_ref, w_ref, a1_ref, a2_ref, h_ref, e1_ref, e2_ref):
    h = jnp.dot(x_ref[...], w_ref[...], preferred_element_type=jnp.float32)
    h_ref[...] = h.astype(h_ref.dtype)        # bf16 store (half the HBM traffic)
    # VPU broadcast-multiply + lane reduction instead of [N,F]@[F,1] matvecs;
    # e1/e2 are computed from the exact f32 h.
    e1_ref[...] = jnp.sum(h * a1_ref[...], axis=-1, keepdims=True)
    e2_ref[...] = jnp.sum(h * a2_ref[...], axis=-1, keepdims=True)


# ---------------------------------------------------------------------------
# Kernel 2: adjacency-masked attention, exact precomputed per-row max.
# Output block is resident across the column axis (accumulator pattern).
# ---------------------------------------------------------------------------
def _attention_kernel(e1_ref, m_ref, e2t_ref, adj_ref, h_ref, o_ref,
                      l_sc, acc_sc, *, alpha, concat, block_k, h_resident):
    j = pl.program_id(1)

    @pl.when(j == 0)
    def _init():
        l_sc[...] = jnp.zeros(l_sc.shape, l_sc.dtype)
        acc_sc[...] = jnp.zeros(acc_sc.shape, acc_sc.dtype)

    mask = adj_ref[...] != 0                           # int8 adjacency tile
    logit = e1_ref[...] + e2t_ref[...]                 # [TM,1]+[1,TK] -> [TM,TK]
    s = _neg_leaky_relu(logit, alpha)                  # -LeakyReLU(logit)
    s = jnp.where(mask, s, _NEG_INF)
    # m is an exact per-row upper bound of s => exp never overflows; masked
    # entries (s = -1e30) underflow exp to exactly 0, so no second select.
    p = jnp.exp(s - m_ref[...])

    l_sc[...] += jnp.sum(p, axis=1, keepdims=True)
    if h_resident:
        start = pl.multiple_of(j * block_k, block_k)
        h_blk = h_ref[pl.ds(start, block_k), :]        # slice VMEM-resident h
    else:
        h_blk = h_ref[...]                             # per-column streamed tile
    # bf16 x bf16 MXU matmul with f32 accumulation.
    acc_sc[...] += jnp.dot(p.astype(h_blk.dtype), h_blk,
                           preferred_element_type=jnp.float32)

    @pl.when(j == pl.num_programs(1) - 1)
    def _finalize():
        # Normalization via EUP reciprocal (free VLIW slot); clamp guards
        # all-masked (padded) rows, which would be NaN in the torch reference.
        inv_l = pl.reciprocal(jnp.maximum(l_sc[...], 1e-30), approx=True)
        h_prime = acc_sc[...] * inv_l
        if concat:
            # ELU(alpha=1): exp only on the clamped negative branch.
            h_prime = jnp.where(h_prime > 0, h_prime,
                                jnp.exp(jnp.minimum(h_prime, 0.0)) - 1.0)
        o_ref[...] = h_prime.astype(o_ref.dtype)


# ---------------------------------------------------------------------------
# Wrapper.
# ---------------------------------------------------------------------------
def sp_graph_attention_forward(x, adj, W, a, *, alpha=0.2, concat=True,
                               block_m=1024, block_k=512, h_resident=None):
    """Forward of SpGraphAttentionLayer.

    x:   [N, in_features] node features
    adj: [N, N] adjacency (any nonzero entry = edge)
    W:   [in_features, out_features]
    a:   [1, 2*out_features]
    """
    x = x.astype(jnp.float32)
    W = W.astype(jnp.float32)
    a = a.astype(jnp.float32)
    n, f_in = x.shape
    f_out = W.shape[1]
    assert W.shape[0] == f_in and a.shape == (1, 2 * f_out)
    assert adj.shape == (n, n)
    assert block_m % _LANE == 0 and block_k % _LANE == 0

    # Clamp tiles to the (128-rounded) problem size; force block_k | block_m so
    # npad = round_up(n, block_m) (padding bounded by a single block_m — the
    # padded int8 adjacency grows as npad^2).
    n128 = _round_up(n, _LANE)
    block_m = min(block_m, n128)
    block_k = min(block_k, n128)
    if block_m % block_k != 0:
        block_k = math.gcd(block_m, block_k)   # still a multiple of 128
    npad = _round_up(n, block_m)               # block_k | block_m | npad

    # int8 adjacency BEFORE padding: never materialize a padded f32 npad^2 array.
    adj_i8 = (adj != 0).astype(jnp.int8)
    if npad != n:
        x_p = jnp.pad(x, ((0, npad - n), (0, 0)))
        adj_i8 = jnp.pad(adj_i8, ((0, npad - n), (0, npad - n)))
    else:
        x_p = x

    a1 = a[:, :f_out]                      # row-node half   [1, F_out]
    a2 = a[:, f_out:]                      # col-node half   [1, F_out]

    n_row = npad // block_m
    n_col = npad // block_k

    # ---- pre-pass: h (bf16), e1, e2 (f32) -----------------------------------
    h, e1, e2 = pl.pallas_call(
        _prepass_kernel,
        out_shape=(jax.ShapeDtypeStruct((npad, f_out), jnp.bfloat16),
                   jax.ShapeDtypeStruct((npad, 1), jnp.float32),
                   jax.ShapeDtypeStruct((npad, 1), jnp.float32)),
        grid_spec=pltpu.PrefetchScalarGridSpec(
            num_scalar_prefetch=0,
            grid=(n_row,),
            in_specs=[pl.BlockSpec((block_m, f_in), lambda i: (i, 0)),
                      pl.BlockSpec((f_in, f_out), lambda i: (0, 0)),
                      pl.BlockSpec((1, f_out), lambda i: (0, 0)),
                      pl.BlockSpec((1, f_out), lambda i: (0, 0))],
            out_specs=(pl.BlockSpec((block_m, f_out), lambda i: (i, 0)),
                       pl.BlockSpec((block_m, 1), lambda i: (i, 0)),
                       pl.BlockSpec((block_m, 1), lambda i: (i, 0)))),
        compiler_params=pltpu.CompilerParams(
            dimension_semantics=("parallel",),
            vmem_limit_bytes=32 * 1024 * 1024),
        cost_estimate=pl.CostEstimate(
            flops=int(2 * npad * f_in * f_out + 4 * npad * f_out),
            transcendentals=0,
            bytes_accessed=int(4 * (npad * f_in + f_in * f_out + 2 * npad)
                               + 2 * npad * f_out)),
    )(x_p, W, a1, a2)

    # Lane-dense key-side logits (layout plumbing done once, outside the hot loop).
    e2t = jnp.transpose(e2)                # [1, npad]

    # Exact per-row max of s: s_ij = -LeakyReLU(e1_i + e2_j) is monotone
    # decreasing in e2_j, so max_j s_ij = -LeakyReLU(e1_i + min_j e2_j).
    # The shift cancels in the normalization, so the result is numerically
    # identical to the torch formula while avoiding exp() overflow.
    e2_min = jnp.min(e2[:n])
    m_row = _neg_leaky_relu(e1 + e2_min, alpha)        # [npad, 1]

    # ---- VMEM budgeting (sized for v7x's 64 MiB physical VMEM) ---------------
    f_lane = _round_up(f_out, _LANE)

    def _vmem_est(resident):
        per_buf = (2 * block_m * _LANE * 4             # e1 + m (lane-padded)
                   + 8 * block_k * 4                   # e2t
                   + block_m * block_k                 # adj int8
                   + block_m * f_lane * 4              # output tile
                   + (npad if resident else block_k) * f_lane * 2)  # h bf16
        scratch = block_m * _LANE * 4 + block_m * f_lane * 4        # l, acc
        return 2 * per_buf + scratch                   # double-buffered

    budget = 40 * 1024 * 1024
    if h_resident is None:
        h_resident = _vmem_est(True) <= budget
    vmem_limit = int(min(max(32 * 1024 * 1024, _vmem_est(h_resident) + (4 << 20)),
                         48 * 1024 * 1024))

    if h_resident:
        # Constant block index => h is DMA'd into VMEM once and stays resident.
        h_spec = pl.BlockSpec((npad, f_out), lambda i, j: (0, 0))
        h_bytes = npad * f_out * 2
    else:
        h_spec = pl.BlockSpec((block_k, f_out), lambda i, j: (j, 0))
        h_bytes = n_row * npad * f_out * 2

    # ---- main pass: masked attention with precomputed row max ----------------
    kern = functools.partial(_attention_kernel, alpha=float(alpha),
                             concat=bool(concat), block_k=int(block_k),
                             h_resident=bool(h_resident))
    out = pl.pallas_call(
        kern,
        out_shape=jax.ShapeDtypeStruct((npad, f_out), jnp.float32),
        grid_spec=pltpu.PrefetchScalarGridSpec(
            num_scalar_prefetch=0,
            grid=(n_row, n_col),
            in_specs=[pl.BlockSpec((block_m, 1), lambda i, j: (i, 0)),       # e1
                      pl.BlockSpec((block_m, 1), lambda i, j: (i, 0)),       # m
                      pl.BlockSpec((1, block_k), lambda i, j: (0, j)),       # e2^T
                      pl.BlockSpec((block_m, block_k), lambda i, j: (i, j)), # adj
                      h_spec],                                               # h
            out_specs=pl.BlockSpec((block_m, f_out), lambda i, j: (i, 0)),
            scratch_shapes=[pltpu.VMEM((block_m, 1), jnp.float32),      # l
                            pltpu.VMEM((block_m, f_out), jnp.float32)]),  # acc
        compiler_params=pltpu.CompilerParams(
            dimension_semantics=("parallel", "arbitrary"),
            vmem_limit_bytes=vmem_limit),
        cost_estimate=pl.CostEstimate(
            flops=int(2 * npad * npad * f_out + 8 * npad * npad),
            transcendentals=int(npad * npad),
            bytes_accessed=int(npad * npad            # int8 adjacency stream
                               + h_bytes              # h (resident or streamed)
                               + 4 * npad * f_out     # output
                               + 16 * npad)),
    )(e1, m_row, e2t, adj_i8, h)

    return out[:n]


# ---------------------------------------------------------------------------
# Plain-JAX reference (mirrors the torch forward with a dense masked formulation).
# ---------------------------------------------------------------------------
def _reference_forward(x, adj, W, a, *, alpha=0.2, concat=True):
    h = x @ W
    f_out = W.shape[1]
    e1 = h @ a[0, :f_out][:, None]         # [N,1]
    e2 = h @ a[0, f_out:][:, None]         # [N,1]
    logit = e1 + e2.T
    s = -jnp.where(logit > 0, logit, alpha * logit)
    mask = adj != 0
    s = jnp.where(mask, s, -jnp.inf)
    m = jnp.max(s, axis=1, keepdims=True)
    p = jnp.where(mask, jnp.exp(s - m), 0.0)
    h_prime = (p @ h) / jnp.sum(p, axis=1, keepdims=True)
    if concat:
        h_prime = jnp.where(h_prime > 0, h_prime,
                            jnp.expm1(jnp.minimum(h_prime, 0.0)))
    return h_prime


if __name__ == "__main__":
    # N=300 pads to 384 with 128-tiles, exercising padded rows/columns and a
    # 3x3 tiled grid on a small problem.
    N, F_IN, F_OUT = 300, 64, 128
    ALPHA = 0.2

    key = jax.random.PRNGKey(0)
    k_x, k_adj, k_w, k_a = jax.random.split(key, 4)

    x = jax.random.normal(k_x, (N, F_IN), jnp.float32)
    adj = (jax.random.uniform(k_adj, (N, N)) > 0.7).astype(jnp.float32)
    adj = jnp.maximum(adj, jnp.eye(N, dtype=jnp.float32))   # self-loops: no empty rows

    # xavier_normal_(gain=1.414), matching the torch initializers.
    std_w = 1.414 * math.sqrt(2.0 / (F_IN + F_OUT))
    W = std_w * jax.random.normal(k_w, (F_IN, F_OUT), jnp.float32)
    std_a = 1.414 * math.sqrt(2.0 / (1 + 2 * F_OUT))
    a = std_a * jax.random.normal(k_a, (1, 2 * F_OUT), jnp.float32)

    ref = _reference_forward(x, adj, W, a, alpha=ALPHA, concat=True)

    # 1) default path: h VMEM-resident, multi-block grid.
    out_res = sp_graph_attention_forward(x, adj, W, a, alpha=ALPHA, concat=True,
                                         block_m=128, block_k=128)
    out_res = jax.block_until_ready(out_res)

    # 2) streamed-h fallback path (used when h would not fit VMEM).
    out_str = sp_graph_attention_forward(x, adj, W, a, alpha=ALPHA, concat=True,
                                         block_m=128, block_k=128,
                                         h_resident=False)
    out_str = jax.block_until_ready(out_str)

    for out in (out_res, out_str):
        assert out.shape == (N, F_OUT) and out.dtype == jnp.float32
        assert bool(jnp.isfinite(out).all())
        err = float(jnp.max(jnp.abs(out - ref)))
        assert err < 5e-2, f"max abs err {err}"
    print("KERNEL_OK")
</pallas_src>

<mosaic_0001>
module attributes {stable_mosaic.version = 11 : i64} {
  func.func @_prepass_kernel(%arg0: i32, %arg1: memref<128x64xf32, #tpu.memory_space<vmem>>, %arg2: memref<64x128xf32, #tpu.memory_space<vmem>>, %arg3: memref<1x128xf32, #tpu.memory_space<vmem>>, %arg4: memref<1x128xf32, #tpu.memory_space<vmem>>, %arg5: memref<128x128xbf16, #tpu.memory_space<vmem>>, %arg6: memref<128x1xf32, #tpu.memory_space<vmem>>, %arg7: memref<128x1xf32, #tpu.memory_space<vmem>>) attributes {dimension_semantics = [#tpu.dimension_semantics<parallel>], iteration_bounds = array<i64: 3>, scalar_prefetch = 0 : i64, scratch_operands = 0 : i64, tpu.core_type = #tpu.core_type<tc>, window_params = [{transform_indices = @transform_0, window_bounds = array<i64: 128, 64>}, {pipeline_mode = #tpu.pipeline_mode<synchronous>, transform_indices = @transform_1, window_bounds = array<i64: 64, 128>}, {pipeline_mode = #tpu.pipeline_mode<synchronous>, transform_indices = @transform_2, window_bounds = array<i64: 1, 128>}, {pipeline_mode = #tpu.pipeline_mode<synchronous>, transform_indices = @transform_3, window_bounds = array<i64: 1, 128>}, {transform_indices = @transform_4, window_bounds = array<i64: 128, 128>}, {transform_indices = @transform_5, window_bounds = array<i64: 128, 1>}, {transform_indices = @transform_6, window_bounds = array<i64: 128, 1>}]} {
    %c0 = arith.constant 0 : index
    %c0_0 = arith.constant 0 : index
    %0 = vector.load %arg1[%c0, %c0_0] : memref<128x64xf32, #tpu.memory_space<vmem>>, vector<128x64xf32>
    %c0_1 = arith.constant 0 : index
    %c0_2 = arith.constant 0 : index
    %1 = vector.load %arg2[%c0_1, %c0_2] : memref<64x128xf32, #tpu.memory_space<vmem>>, vector<64x128xf32>
    %cst = arith.constant dense<0.000000e+00> : vector<128x128xf32>
    %2 = tpu.matmul %0, %1, %cst {dimension_numbers = #tpu.dot_dimension_numbers<[1], [0], [0], [1], [0, 0, 1, 1], [], []>} : vector<128x64xf32>, vector<64x128xf32>, vector<128x128xf32> -> vector<128x128xf32>
    %3 = arith.truncf %2 : vector<128x128xf32> to vector<128x128xbf16>
    %c0_3 = arith.constant 0 : index
    %c0_4 = arith.constant 0 : index
    %4 = vector.load %arg5[%c0_3, %c0_4] : memref<128x128xbf16, #tpu.memory_space<vmem>>, vector<128x128xbf16>
    tpu.vector_store %arg5[%c0_3, %c0_4], %3 {strides = array<i32>} : memref<128x128xbf16, #tpu.memory_space<vmem>>, vector<128x128xbf16>,
    %c0_5 = arith.constant 0 : index
    %c0_6 = arith.constant 0 : index
    %5 = vector.load %arg3[%c0_5, %c0_6] : memref<1x128xf32, #tpu.memory_space<vmem>>, vector<1x128xf32>
    %6 = vector.broadcast %5 : vector<1x128xf32> to vector<128x128xf32>
    %7 = arith.mulf %2, %6 : vector<128x128xf32>
    %cst_7 = arith.constant dense<0.000000e+00> : vector<128xf32>
    %8 = vector.multi_reduction <add>, %7, %cst_7 [1] : vector<128x128xf32> to vector<128xf32>
    %9 = vector.shape_cast %8 : vector<128xf32> to vector<128x1xf32>
    %c0_8 = arith.constant 0 : index
    %c0_9 = arith.constant 0 : index
    %10 = vector.load %arg6[%c0_8, %c0_9] : memref<128x1xf32, #tpu.memory_space<vmem>>, vector<128x1xf32>
    tpu.vector_store %arg6[%c0_8, %c0_9], %9 {strides = array<i32>} : memref<128x1xf32, #tpu.memory_space<vmem>>, vector<128x1xf32>,
    %c0_10 = arith.constant 0 : index
    %c0_11 = arith.constant 0 : index
    %11 = vector.load %arg4[%c0_10, %c0_11] : memref<1x128xf32, #tpu.memory_space<vmem>>, vector<1x128xf32>
    %12 = vector.broadcast %11 : vector<1x128xf32> to vector<128x128xf32>
    %13 = arith.mulf %2, %12 : vector<128x128xf32>
    %cst_12 = arith.constant dense<0.000000e+00> : vector<128xf32>
    %14 = vector.multi_reduction <add>, %13, %cst_12 [1] : vector<128x128xf32> to vector<128xf32>
    %15 = vector.shape_cast %14 : vector<128xf32> to vector<128x1xf32>
    %c0_13 = arith.constant 0 : index
    %c0_14 = arith.constant 0 : index
    %16 = vector.load %arg7[%c0_13, %c0_14] : memref<128x1xf32, #tpu.memory_space<vmem>>, vector<128x1xf32>
    tpu.vector_store %arg7[%c0_13, %c0_14], %15 {strides = array<i32>} : memref<128x1xf32, #tpu.memory_space<vmem>>, vector<128x1xf32>,
    return
  }
  func.func @transform_0(%arg0: i32) -> (i32, i32) {
    %c0_i32 = arith.constant 0 : i32
    %c0_i32_0 = arith.constant 0 : i32
    return %arg0, %c0_i32 : i32, i32
  }
  func.func @transform_1(%arg0: i32) -> (i32, i32) {
    %c0_i32 = arith.constant 0 : i32
    %c0_i32_0 = arith.constant 0 : i32
    %c0_i32_1 = arith.constant 0 : i32
    return %c0_i32, %c0_i32_0 : i32, i32
  }
  func.func @transform_2(%arg0: i32) -> (i32, i32) {
    %c0_i32 = arith.constant 0 : i32
    %c0_i32_0 = arith.constant 0 : i32
    %c0_i32_1 = arith.constant 0 : i32
    return %c0_i32, %c0_i32_0 : i32, i32
  }
  func.func @transform_3(%arg0: i32) -> (i32, i32) {
    %c0_i32 = arith.constant 0 : i32
    %c0_i32_0 = arith.constant 0 : i32
    %c0_i32_1 = arith.constant 0 : i32
    return %c0_i32, %c0_i32_0 : i32, i32
  }
  func.func @transform_4(%arg0: i32) -> (i32, i32) {
    %c0_i32 = arith.constant 0 : i32
    %c0_i32_0 = arith.constant 0 : i32
    return %arg0, %c0_i32 : i32, i32
  }
  func.func @transform_5(%arg0: i32) -> (i32, i32) {
    %c0_i32 = arith.constant 0 : i32
    %c0_i32_0 = arith.constant 0 : i32
    return %arg0, %c0_i32 : i32, i32
  }
  func.func @transform_6(%arg0: i32) -> (i32, i32) {
    %c0_i32 = arith.constant 0 : i32
    %c0_i32_0 = arith.constant 0 : i32
    return %arg0, %c0_i32 : i32, i32
  }
}

</mosaic_0001>

<bundles_post_ra>
// kernel: tpu_custom_call.1
= control target key start
LH: loop header
LB: loop body
LE: loop exit
PB: predicated region body
PF: predicated region fallthrough
CT: control target
= control target key end

     0   :  { %12 = vsyncpa [#allocation3], 0  ;;  %s1506_s0 = inlined_call_operand.vmem [shape: f32[384,64], index: 0, kind: input, shape index: {}]   ;;  %s1507_s1 = inlined_call_operand.vmem [shape: f32[64,128], index: 1, kind: input, shape index: {}]   ;;  %s1508_s2 = inlined_call_operand.vmem [shape: f32[1,128], index: 2, kind: input, shape index: {}]   ;;  %s1509_s3 = inlined_call_operand.vmem [shape: f32[1,128], index: 3, kind: input, shape index: {}]   ;;  %s1510_s4 = inlined_call_operand.hbm [shape: bf16[384,128], index: 4, kind: output, shape index: {0}]   ;;  %s1511_s5 = inlined_call_operand.vmem [shape: f32[384,1], index: 5, kind: output, shape index: {1}]   ;;  %s1512_s6 = inlined_call_operand.vmem [shape: f32[384,1], index: 6, kind: output, shape index: {2}]  }
   0x1   :  { %14 = vsyncpa [#allocation3 + $0x1], 0  ;;  %s1210_s21 = smov 0   ;;  %s1212_s22 = smov 0  }
   0x2   :  { %s1214_s23 = smov 0   ;;  %s1216_s24 = smov 0  }
   0x3 LB: > { %s1231_s25 = sadd.s32 4294967295, %s1170_s24   ;;  %s865_s26 = sadd.s32 4294967294, %s1170_s24   ;;  %s1170_s24 = sphi %s1216_s24, %s1518_s24   ;;  %s1166_s23 = sphi %s1214_s23, %s1517_s23   ;;  %s1162_s22 = sphi %s1212_s22, %s1516_s22   ;;  %s1158_s21 = sphi %s1210_s21, %s1515_s21  }
   0x4   : > { %s1235_s27 = sadd.s32 1, %s1170_s24   ;;  %s116_s28 = sadd.s32 1, %s1166_s23 }
   0x5   : > { %s113_s29 = ssub.s32 %s1170_s24, %s1235_s27  ;;  %p126_p0 = scmp.ne.s32.totalorder %s1166_s23, %s1162_s22 }
   0x6   : > { %p114_p1 = scmp.eq.s32.totalorder %s113_s29, 0  ;;  %p127_p2 = scmp.eq.s32.totalorder %s1231_s25, 2 }
   0x7   : > { %p132_p3 = scmp.ne.s32.totalorder %s1162_s22, %s1158_s21  ;;  %p133_p4 = scmp.eq.s32.totalorder %s865_s26, 2 }
   0x8   : > { %s1246_s30 = scalar_select %p114_p1, %s1166_s23, %s116_s28  }
   0x9   : > { %p1248_p5 = por %p127_p2, %p126_p0  ;;  %p1252_p6 = por %p133_p4, %p132_p3 }
   0xa   : > { %p868_p7 = scmp.ge.s32.totalorder %s1170_s24, 1  ;;  %p221_p8 = scmp.lt.s32.totalorder %s1170_s24, 4 }
   0xc   : > { %p222_p9 = pnand %p868_p7, %p221_p8 }
   0xd   : > { %v296_v0 = vld [vmem:[%s1507_s1] sm:$0xff] (!%p222_p9)  ;;  %v297_v1 = vld [vmem:[%s1507_s1 + $0x8] sm:$0xff] (!%p222_p9)  ;;  %v298_v2 = vld [vmem:[%s1507_s1 + $0x10] sm:$0xff] (!%p222_p9)  ;;  %s870_s15 = sshll.u32 (!%p222_p9), %s1231_s25, 4  ;;  %vm304_vm0 = vcmask (!%p222_p9), 523264   ;;  %s931_s29 = sshll.u32 (!%p222_p9), %s1231_s25, 10 }
   0xe   : > { %225 = sbr.rel (%p222_p9) target bundleno = 450 (0x1c2), region = 36  ;;  %v1043_v3 = vpack.c.bf16 (!%p222_p9), %v297_v1, %v296_v0  ;;  %v299_v4 = vld [vmem:[%s1507_s1 + $0x18] sm:$0xff] (!%p222_p9)  ;;  %p262_p10 = scmp.lt.s32.totalorder (!%p222_p9), %s870_s15, 47  ;;  %v300_v6 = vld [vmem:[%s1507_s1 + $0x20] sm:$0xff] (!%p222_p9)  ;;  %v301_v7 = vld [vmem:[%s1507_s1 + $0x28] sm:$0xff] (!%p222_p9) }
   0xf   : > { %v1047_v5 = vpack.c.bf16 (!%p222_p9), %v299_v4, %v298_v2  ;;  %v1051_v8 = vpack.c.bf16 (!%p222_p9), %v301_v7, %v300_v6  ;;  %v302_v9 = vld [vmem:[%s1507_s1 + $0x30] sm:$0xff] (!%p222_p9)  ;;  %v303_v10 = vld [vmem:[%s1507_s1 + $0x38] sm:$0xff] (!%p222_p9)  ;;  %v1329_v28 = vld [vmem:[%s1508_s2] ss:$0 sm:$0xff] (!%p222_p9)  ;;  %s1383_s12 = scalar_lea.hbm (!%p222_p9), %s1510_s4, %s931_s29  ;;  %s1172_s25 = smov (!%p222_p9), [#allocation2]  }
  0x10   : > { %1044 = vmatprep.subr.bf16.mxu0 (!%p222_p9), %v1043_v3  ;;  %1059 = vmatprep.subr.bf16.mxu1 (!%p222_p9), %v1043_v3  ;;  %v1055_v13 = vpack.c.bf16 (!%p222_p9), %v303_v10, %v302_v9  ;;  %v1336_v37 = vld [vmem:[%s1509_s3] ss:$0 sm:$0xff] (!%p222_p9) }
  0x11   : > { %1046 = vmatpush3.bf16.msra.mxu0 (!%p222_p9), %v1043_v3  ;;  %1063 = vmatpush3.bf16.msra.mxu1 (!%p222_p9), %v1043_v3 }
  0x12   : > { %1048 = vmatprep.subr.bf16.mxu0 (!%p222_p9), %v1047_v5  ;;  %1060 = vmatprep.subr.bf16.mxu1 (!%p222_p9), %v1047_v5 }
  0x15   : > { %s1520_s15 = smov (!%p262_p10, %s870_s15), 47  ;;  %1050 = vmatpush3.bf16.msra.mxu0 %v1047_v5  ;;  %1064 = vmatpush3.bf16.msra.mxu1 %v1047_v5 }
  0x16   : > { %s1277_s28 = sshll.u32 %s1520_s15, 3  ;;  %1052 = vmatprep.subr.bf16.mxu0 %v1051_v8  ;;  %1061 = vmatprep.subr.bf16.mxu1 %v1051_v8  ;;  %s244_s15 = sand.u32 1, %s1162_s22  }
  0x17   : > { %s1289_s14 = scalar_lea.vmem %s1506_s0, %s1277_s28  ;;  %s869_s16 = sshll.u32 %s244_s15, 6 }
  0x18   : > { %v280_v11 = vld [vmem:[%s1289_s14] sm:$0xff]  ;;  %v281_v14 = vld [vmem:[%s1289_s14 + $0x8] sm:$0xff]  ;;  %v282_v16 = vld [vmem:[%s1289_s14 + $0x10] sm:$0xff]  ;;  %s1338_s26 = scalar_lea.vmem [#allocation2], %s869_s16  ;;  %s1389_s13 = scalar_lea.sflag [#allocation3], %s244_s15 }
  0x19   : > { %v288_v12 = vld [vmem:[%s1289_s14 + $0x40] sm:$0xff]  ;;  %1019 = vmatprep.mubr.msk.f32.mxu0 %vm304_vm0, %v280_v11  ;;  %1054 = vmatpush3.bf16.msra.mxu0 %v1051_v8  ;;  %v289_v15 = vld [vmem:[%s1289_s14 + $0x48] sm:$0xff]  ;;  %v290_v17 = vld [vmem:[%s1289_s14 + $0x50] sm:$0xff]  ;;  %s745_s9 = sshll.u32 %s1338_s26, 4  ;;  %s1112_s16 = sshll.u32 %s1172_s25, 4  ;;  %s1385_s9 = int_to_ptr.vmem [resolvable:$true] %s745_s9  ;;  %s1113_s16 = int_to_ptr.vmem [resolvable:$false] %s1112_s16 }
  0x1a   : > { %1031 = vmatprep.mubr.msk.f32.mxu1 %vm304_vm0, %v288_v12  ;;  %1065 = vmatpush3.bf16.msra.mxu1 %v1051_v8  ;;  %v283_v18 = vld [vmem:[%s1289_s14 + $0x18] sm:$0xff]  ;;  %v284_v20 = vld [vmem:[%s1289_s14 + $0x20] sm:$0xff]  ;;  %v285_v22 = vld [vmem:[%s1289_s14 + $0x28] sm:$0xff]  ;;  %s1114_s17 = scalar_lea.vmem %s1113_s16, 2048  ;;  %p1115_p0 = scmp.lt.s32.totalorder %s1385_s9, %s1113_s16 }
  0x1b   : > { %1056 = vmatprep.subr.bf16.mxu0 %v1055_v13  ;;  %1062 = vmatprep.subr.bf16.mxu1 %v1055_v13  ;;  %v291_v19 = vld [vmem:[%s1289_s14 + $0x58] sm:$0xff]  ;;  %v292_v21 = vld [vmem:[%s1289_s14 + $0x60] sm:$0xff]  ;;  %v293_v23 = vld [vmem:[%s1289_s14 + $0x68] sm:$0xff] }
  0x1c   : > { %v286_v24 = vld [vmem:[%s1289_s14 + $0x30] sm:$0xff]  ;;  %v287_v26 = vld [vmem:[%s1289_s14 + $0x38] sm:$0xff] }
  0x1d   : > { %1058 = vmatpush3.bf16.msra.mxu0 %v1055_v13  ;;  %v294_v25 = vld [vmem:[%s1289_s14 + $0x70] sm:$0xff]  ;;  %v295_v27 = vld [vmem:[%s1289_s14 + $0x78] sm:$0xff]  ;;  %s1108_s14 = scalar_lea.vmem %s1385_s9, 1024 }
  0x1e   : > { %1066 = vmatpush3.bf16.msra.mxu1 %v1055_v13  ;;  %p1109_p11 = scmp.ne.s32.totalorder %s1385_s9, %s1108_s14  ;;  %p1116_p1 = scmp.lt.s32.totalorder %s1114_s17, %s1108_s14 }
  0x20   : > { %1020 = vmatmul.mubr.msk.f32.vlgmr.msra.gmra.mrb[0].mxu0 %vm304_vm0, %v281_v14  ;;  %p1110_p12 = pnand %p1109_p11, %p1248_p5  ;;  %p1117_p2 = por %p1116_p1, %p1115_p0 }
  0x21   : > { %1032 = vmatmul.mubr.msk.f32.vlgmr.msra.gmra.mrb[0].mxu1 %vm304_vm0, %v289_v15  ;;  %1022 = vmatprep.mubr.msk.f32.mxu0 %vm304_vm0, %v282_v16 }
  0x22   : > { %1034 = vmatprep.mubr.msk.f32.mxu1 %vm304_vm0, %v290_v17  ;;  %p1111_p13 = pneg %p1110_p12 }
  0x24   : > { %1023 = vmatmul.mubr.msk.f32.gmra.mrb[2].mxu0 %vm304_vm0, %v283_v18  ;;  %p1118_p3 = pnand %p1117_p2, %p1111_p13 }
  0x25   : > { %1035 = vmatmul.mubr.msk.f32.gmra.mrb[2].mxu1 %vm304_vm0, %v291_v19  ;;  %1025 = vmatprep.mubr.msk.f32.mxu0 %vm304_vm0, %v284_v20 }
  0x26   : > { %1037 = vmatprep.mubr.msk.f32.mxu1 %vm304_vm0, %v292_v21 }
  0x28   : > { %1026 = vmatmul.mubr.msk.f32.gmra.mrb[4].mxu0 %vm304_vm0, %v285_v22 }
  0x29   : > { %1038 = vmatmul.mubr.msk.f32.gmra.mrb[4].mxu1 %vm304_vm0, %v293_v23  ;;  %1028 = vmatprep.mubr.msk.f32.mxu0 %vm304_vm0, %v286_v24 }
  0x2a   : > { %1040 = vmatprep.mubr.msk.f32.mxu1 %vm304_vm0, %v294_v25 }
  0x2c   : > { %1029 = vmatmul.mubr.msk.f32.gmra.mrb[6].mxu0 %vm304_vm0, %v287_v26 }
  0x2d   : > { %1041 = vmatmul.mubr.msk.f32.gmra.mrb[6].mxu1 %vm304_vm0, %v295_v27 }
  0xf3   : > { %v1021_v29 = vpop.f32.mrb[0].mxu0 }
  0xf4   : > { %v1033_v30 = vpop.f32.mrb[0].mxu1  ;;  %v419_v31 = vpop.f32.mrb[1].mxu0  ;;  %v586_v34 = vmul.f32 %v1021_v29, %v1329_v28  ;;  %v658_v40 = vmul.f32 %v1021_v29, %v1336_v37 }
  0xf5   : > { %v459_v32 = vpop.f32.mrb[1].mxu1  ;;  %v594_v33 = vmul.f32 %v1033_v30, %v1329_v28  ;;  %v935_v35 = vpack.c.bf16 %v1021_v29, %v419_v31  ;;  %v585_v41 = vmul.f32 %v1329_v28, %v419_v31  ;;  %v666_v48 = vmul.f32 %v1033_v30, %v1336_v37 }
  0xf6   : > { %v955_v36 = vpack.c.bf16 %v1033_v30, %v459_v32  ;;  %603 = vadd.xlane.f32.xlu0 %v586_v34  ;;  %v593_v49 = vmul.f32 %v1329_v28, %v459_v32  ;;  %v657_v57 = vmul.f32 %v1336_v37, %v419_v31  ;;  %v665_v63 = vmul.f32 %v1336_v37, %v459_v32 }
  0xf7   : > { %619 = vadd.xlane.f32.xlu1 %v594_v33  ;;  %936 = vst [vmem:[%s1338_s26] sm:$0xff] %v935_v35   ;;  %v1024_v38 = vpop.f32.mrb[2].mxu0 }
  0xf8   : > { %975 = vst [vmem:[%s1338_s26 + $0x20] sm:$0xff] %v955_v36   ;;  %v1036_v39 = vpop.f32.mrb[2].mxu1  ;;  %v429_v42 = vpop.f32.mrb[3].mxu0  ;;  %v588_v54 = vmul.f32 %v1024_v38, %v1329_v28  ;;  %v660_v1 = vmul.f32 %v1024_v38, %v1336_v37 }
  0xf9   : > { %v469_v43 = vpop.f32.mrb[3].mxu1  ;;  %v940_v44 = vpack.c.bf16 %v1024_v38, %v429_v42  ;;  %v596_v62 = vmul.f32 %v1036_v39, %v1329_v28  ;;  %v668_v2 = vmul.f32 %v1036_v39, %v1336_v37  ;;  %v659_v3 = vmul.f32 %v1336_v37, %v429_v42 }
  0xfa   : > { %v960_v45 = vpack.c.bf16 %v1036_v39, %v469_v43  ;;  %601 = vadd.xlane.f32.xlu0 %v585_v41  ;;  %v595_v0 = vmul.f32 %v1329_v28, %v469_v43  ;;  %v667_v4 = vmul.f32 %v1336_v37, %v469_v43  ;;  %v587_v5 = vmul.f32 %v1329_v28, %v429_v42 }
  0xfb   : > { %675 = vadd.xlane.f32.xlu1 %v658_v40  ;;  %972 = vst [vmem:[%s1338_s26 + $0x8] sm:$0xff] %v940_v44   ;;  %v1027_v46 = vpop.f32.mrb[4].mxu0 }
  0xfc   : > { %976 = vst [vmem:[%s1338_s26 + $0x28] sm:$0xff] %v960_v45   ;;  %v1039_v47 = vpop.f32.mrb[4].mxu1  ;;  %v439_v50 = vpop.f32.mrb[5].mxu0  ;;  %v590_v6 = vmul.f32 %v1027_v46, %v1329_v28  ;;  %v662_v10 = vmul.f32 %v1027_v46, %v1336_v37 }
  0xfd   : > { %v479_v51 = vpop.f32.mrb[5].mxu1  ;;  %v945_v52 = vpack.c.bf16 %v1027_v46, %v439_v50  ;;  %v589_v7 = vmul.f32 %v1329_v28, %v439_v50  ;;  %v598_v8 = vmul.f32 %v1039_v47, %v1329_v28  ;;  %v661_v11 = vmul.f32 %v1336_v37, %v439_v50 }
  0xfe   : > { %v965_v53 = vpack.c.bf16 %v1039_v47, %v479_v51  ;;  %617 = vadd.xlane.f32.xlu0 %v593_v49  ;;  %v597_v9 = vmul.f32 %v1329_v28, %v479_v51  ;;  %v670_v12 = vmul.f32 %v1039_v47, %v1336_v37  ;;  %v669_v13 = vmul.f32 %v1336_v37, %v479_v51 }
  0xff   : > { %691 = vadd.xlane.f32.xlu1 %v666_v48  ;;  %973 = vst [vmem:[%s1338_s26 + $0x10] sm:$0xff] %v945_v52   ;;  %v1030_v55 = vpop.f32.mrb[6].mxu0 }
 0x100   : > { %977 = vst [vmem:[%s1338_s26 + $0x30] sm:$0xff] %v965_v53   ;;  %v1042_v56 = vpop.f32.mrb[6].mxu1  ;;  %v449_v58 = vpop.f32.mrb[7].mxu0  ;;  %v592_v14 = vmul.f32 %v1030_v55, %v1329_v28  ;;  %v664_v18 = vmul.f32 %v1030_v55, %v1336_v37 }
 0x101   : > { %v489_v59 = vpop.f32.mrb[7].mxu1  ;;  %v950_v60 = vpack.c.bf16 %v1030_v55, %v449_v58  ;;  %v591_v15 = vmul.f32 %v1329_v28, %v449_v58  ;;  %v600_v16 = vmul.f32 %v1042_v56, %v1329_v28  ;;  %v663_v19 = vmul.f32 %v1336_v37, %v449_v58 }
 0x102   : > { %v970_v61 = vpack.c.bf16 %v1042_v56, %v489_v59  ;;  %673 = vadd.xlane.f32.xlu0 %v657_v57  ;;  %v599_v17 = vmul.f32 %v1329_v28, %v489_v59  ;;  %v672_v20 = vmul.f32 %v1042_v56, %v1336_v37  ;;  %v671_v21 = vmul.f32 %v1336_v37, %v489_v59 }
 0x103   : > { %607 = vadd.xlane.f32.xlu1 %v588_v54  ;;  %974 = vst [vmem:[%s1338_s26 + $0x18] sm:$0xff] %v950_v60  }
 0x104   : > { %978 = vst [vmem:[%s1338_s26 + $0x38] sm:$0xff] %v970_v61  }
 0x106   : > { %689 = vadd.xlane.f32.xlu0 %v665_v63 }
 0x107   : > { %623 = vadd.xlane.f32.xlu1 %v596_v62 }
 0x10a   : > { %621 = vadd.xlane.f32.xlu0 %v595_v0 }
 0x10b   : > { %679 = vadd.xlane.f32.xlu1 %v660_v1 }
 0x10e   : > { %677 = vadd.xlane.f32.xlu0 %v659_v3 }
 0x10f   : > { %695 = vadd.xlane.f32.xlu1 %v668_v2 }
 0x112   : > { %693 = vadd.xlane.f32.xlu0 %v667_v4 }
 0x113   : > { %605 = vadd.xlane.f32.xlu1 %v587_v5 }
 0x116   : > { %609 = vadd.xlane.f32.xlu0 %v589_v7 }
 0x117   : > { %611 = vadd.xlane.f32.xlu1 %v590_v6 }
 0x11a   : > { %625 = vadd.xlane.f32.xlu0 %v597_v9 }
 0x11b   : > { %627 = vadd.xlane.f32.xlu1 %v598_v8 }
 0x11e   : > { %681 = vadd.xlane.f32.xlu0 %v661_v11 }
 0x11f   : > { %683 = vadd.xlane.f32.xlu1 %v662_v10 }
 0x122   : > { %697 = vadd.xlane.f32.xlu0 %v669_v13 }
 0x123   : > { %699 = vadd.xlane.f32.xlu1 %v670_v12 }
 0x126   : > { %613 = vadd.xlane.f32.xlu0 %v591_v15 }
 0x127   : > { %615 = vadd.xlane.f32.xlu1 %v592_v14 }
 0x12a   : > { %629 = vadd.xlane.f32.xlu0 %v599_v17 }
 0x12b   : > { %631 = vadd.xlane.f32.xlu1 %v600_v16 }
 0x12e   : > { %685 = vadd.xlane.f32.xlu0 %v663_v19 }
 0x12f   : > { %687 = vadd.xlane.f32.xlu1 %v664_v18 }
 0x132   : > { %701 = vadd.xlane.f32.xlu0 %v671_v21 }
 0x133   : > { %703 = vadd.xlane.f32.xlu1 %v672_v20 }
 0x134   : > { %1121 = shalt.err (!%p1118_p3)
}
 0x135   : > { %s1122_s15 = scalar_lea.hbm %s1383_s12, 1024  ;;  %s1126_s20 = scalar_lea.hbm %s1510_s4, 3072 }
 0x136   : > { %p1123_p4 = scmp.ne.s32.totalorder %s1383_s12, %s1122_s15  ;;  %p1127_p9 = scmp.lt.u32.totalorder %s1383_s12, %s1510_s4 }
 0x137   : > { %p1128_p10 = scmp.lt.u32.totalorder %s1126_s20, %s1122_s15  ;;  %p1130_p12 = scmp.lt.u32.totalorder %s1122_s15, %s1383_s12 }
 0x138   : > { %p1124_p7 = pnand %p1123_p4, %p1248_p5 }
 0x139   : > { %p1129_p11 = por %p1128_p10, %p1127_p9 }
 0x13a   : > { %p1125_p8 = pneg %p1124_p7 }
 0x13b   : > { %p1131_p13 = por %p1130_p12, %p1129_p11 }
 0x13d   : > { %p1132_p0 = pnand %p1131_p13, %p1125_p8 }
 0x13f   : > { %1135 = shalt.err (!%p1132_p0)
}
 0x140   : > { %s1173_s10 = smov 64   ;;  %s1174_s11 = smov 4   ;;  %vm633_vm1 = vcmask 7168  }
 0x141   : > { %1067 = dma.vmem_to_hbm [thread:$0]  (%p1248_p5), %s1385_s9, 1024, %s1383_s12, %s1389_s13, %s1173_s10, %s1173_s10, %s1174_s11  }
 0x142   : > { %s1417_s16 = scalar_lea.vmem %s1511_s5, %s1277_s28  ;;  %s1427_s9 = scalar_lea.vmem %s1512_s6, %s1277_s28 }
 0x183   : > { %v604_v23 = vpop.xlane.xlu0 %603 }
 0x184   : > { %v620_v22 = vpop.xlane.xlu1 %619  ;;  %635 = vst.msk [vmem:[%s1417_s16 + $0x8] sm:$0xff] %vm633_vm1, %v604_v23 }
 0x185   : > { %643 = vst.msk [vmem:[%s1417_s16 + $0x48] sm:$0xff] %vm633_vm1, %v620_v22 }
 0x187   : > { %v602_v25 = vpop.xlane.xlu0 %601 }
 0x188   : > { %v676_v24 = vpop.xlane.xlu1 %675  ;;  %634 = vst.msk [vmem:[%s1417_s16] sm:$0xff] %vm633_vm1, %v602_v25 }
 0x189   : > { %706 = vst.msk [vmem:[%s1427_s9 + $0x8] sm:$0xff] %vm633_vm1, %v676_v24 }
 0x18b   : > { %v618_v27 = vpop.xlane.xlu0 %617 }
 0x18c   : > { %v692_v26 = vpop.xlane.xlu1 %691  ;;  %642 = vst.msk [vmem:[%s1417_s16 + $0x40] sm:$0xff] %vm633_vm1, %v618_v27 }
 0x18d   : > { %714 = vst.msk [vmem:[%s1427_s9 + $0x48] sm:$0xff] %vm633_vm1, %v692_v26 }
 0x18f   : > { %v674_v28 = vpop.xlane.xlu0 %673 }
 0x190   : > { %v608_v29 = vpop.xlane.xlu1 %607  ;;  %705 = vst.msk [vmem:[%s1427_s9] sm:$0xff] %vm633_vm1, %v674_v28 }
 0x191   : > { %637 = vst.msk [vmem:[%s1417_s16 + $0x18] sm:$0xff] %vm633_vm1, %v608_v29 }
 0x193   : > { %v690_v30 = vpop.xlane.xlu0 %689 }
 0x194   : > { %v624_v31 = vpop.xlane.xlu1 %623  ;;  %713 = vst.msk [vmem:[%s1427_s9 + $0x40] sm:$0xff] %vm633_vm1, %v690_v30 }
 0x195   : > { %645 = vst.msk [vmem:[%s1417_s16 + $0x58] sm:$0xff] %vm633_vm1, %v624_v31 }
 0x197   : > { %v622_v32 = vpop.xlane.xlu0 %621 }
 0x198   : > { %v680_v33 = vpop.xlane.xlu1 %679  ;;  %644 = vst.msk [vmem:[%s1417_s16 + $0x50] sm:$0xff] %vm633_vm1, %v622_v32 }
 0x199   : > { %708 = vst.msk [vmem:[%s1427_s9 + $0x18] sm:$0xff] %vm633_vm1, %v680_v33 }
 0x19b   : > { %v678_v35 = vpop.xlane.xlu0 %677 }
 0x19c   : > { %v696_v34 = vpop.xlane.xlu1 %695  ;;  %707 = vst.msk [vmem:[%s1427_s9 + $0x10] sm:$0xff] %vm633_vm1, %v678_v35 }
 0x19d   : > { %716 = vst.msk [vmem:[%s1427_s9 + $0x58] sm:$0xff] %vm633_vm1, %v696_v34 }
 0x19f   : > { %v694_v36 = vpop.xlane.xlu0 %693 }
 0x1a0   : > { %v606_v37 = vpop.xlane.xlu1 %605  ;;  %715 = vst.msk [vmem:[%s1427_s9 + $0x50] sm:$0xff] %vm633_vm1, %v694_v36 }
 0x1a1   : > { %636 = vst.msk [vmem:[%s1417_s16 + $0x10] sm:$0xff] %vm633_vm1, %v606_v37 }
 0x1a3   : > { %v610_v39 = vpop.xlane.xlu0 %609 }
 0x1a4   : > { %v612_v38 = vpop.xlane.xlu1 %611  ;;  %638 = vst.msk [vmem:[%s1417_s16 + $0x20] sm:$0xff] %vm633_vm1, %v610_v39 }
 0x1a5   : > { %639 = vst.msk [vmem:[%s1417_s16 + $0x28] sm:$0xff] %vm633_vm1, %v612_v38 }
 0x1a7   : > { %v626_v41 = vpop.xlane.xlu0 %625 }
 0x1a8   : > { %v628_v40 = vpop.xlane.xlu1 %627  ;;  %646 = vst.msk [vmem:[%s1417_s16 + $0x60] sm:$0xff] %vm633_vm1, %v626_v41 }
 0x1a9   : > { %647 = vst.msk [vmem:[%s1417_s16 + $0x68] sm:$0xff] %vm633_vm1, %v628_v40 }
 0x1ab   : > { %v682_v43 = vpop.xlane.xlu0 %681 }
 0x1ac   : > { %v684_v42 = vpop.xlane.xlu1 %683  ;;  %709 = vst.msk [vmem:[%s1427_s9 + $0x20] sm:$0xff] %vm633_vm1, %v682_v43 }
 0x1ad   : > { %710 = vst.msk [vmem:[%s1427_s9 + $0x28] sm:$0xff] %vm633_vm1, %v684_v42 }
 0x1af   : > { %v698_v45 = vpop.xlane.xlu0 %697 }
 0x1b0   : > { %v700_v44 = vpop.xlane.xlu1 %699  ;;  %717 = vst.msk [vmem:[%s1427_s9 + $0x60] sm:$0xff] %vm633_vm1, %v698_v45 }
 0x1b1   : > { %718 = vst.msk [vmem:[%s1427_s9 + $0x68] sm:$0xff] %vm633_vm1, %v700_v44 }
 0x1b3   : > { %v614_v47 = vpop.xlane.xlu0 %613 }
 0x1b4   : > { %v616_v46 = vpop.xlane.xlu1 %615  ;;  %640 = vst.msk [vmem:[%s1417_s16 + $0x30] sm:$0xff] %vm633_vm1, %v614_v47 }
 0x1b5   : > { %641 = vst.msk [vmem:[%s1417_s16 + $0x38] sm:$0xff] %vm633_vm1, %v616_v46 }
 0x1b7   : > { %v630_v49 = vpop.xlane.xlu0 %629 }
 0x1b8   : > { %v632_v48 = vpop.xlane.xlu1 %631  ;;  %648 = vst.msk [vmem:[%s1417_s16 + $0x70] sm:$0xff] %vm633_vm1, %v630_v49 }
 0x1b9   : > { %649 = vst.msk [vmem:[%s1417_s16 + $0x78] sm:$0xff] %vm633_vm1, %v632_v48 }
 0x1bb   : > { %v686_v51 = vpop.xlane.xlu0 %685 }
 0x1bc   : > { %v688_v50 = vpop.xlane.xlu1 %687  ;;  %711 = vst.msk [vmem:[%s1427_s9 + $0x30] sm:$0xff] %vm633_vm1, %v686_v51 }
 0x1bd   : > { %712 = vst.msk [vmem:[%s1427_s9 + $0x38] sm:$0xff] %vm633_vm1, %v688_v50 }
 0x1bf   : > { %v702_v53 = vpop.xlane.xlu0 %701 }
 0x1c0   : > { %v704_v52 = vpop.xlane.xlu1 %703  ;;  %719 = vst.msk [vmem:[%s1427_s9 + $0x70] sm:$0xff] %vm633_vm1, %v702_v53 }
 0x1c1   : > { %720 = vst.msk [vmem:[%s1427_s9 + $0x78] sm:$0xff] %vm633_vm1, %v704_v52 }
 0x1c2 PF: > { %p1073_p5 = scmp.ge.s32.totalorder %s1170_s24, 2  ;;  %s768_s28 = sand.u32 1, %s1158_s21  }
 0x1c3   : > { %s769_s12 = scalar_lea.sflag [#allocation3], %s768_s28 }
 0x1c4   : > { %p1070_p1 = pnand %p1073_p5, %p1252_p6 }
 0x1c6   : > { %1153 = dma.done.wait (!%p1070_p1), %s769_s12, 1024  }
 0x1c7   : > { %1155 = vsyncadd (!%p1070_p1), %s769_s12, 4294966272  ;;  %p17_p2 = scmp.ge.s32.totalorder %s1235_s27, 5   ;;  %s1515_s21 = smov %s1162_s22 }
 0x1c8   : > { %s1516_s22 = smov %s1166_s23  ;;  %s1517_s23 = smov %s1246_s30 }
 0x1c9   : > { %s1518_s24 = smov %s1235_s27  ;;  %19 = sbr.rel (!%p17_p2) target bundleno = 3 (0x3), region = 95 }
 0x1d0   :  { %790 = vsyncpa [#allocation3], 1 }
 0x1d1   :  { %792 = vsyncpa [#allocation3 + $0x1], 1 }

</bundles_post_ra>
